<compile_context>
chip_gen: v6e
topology: v6e:2x2x1
jax: 0.10.0
libtpu: 0.0.40
codegen_flags: <defaults>
</compile_context>

<pallas_src>
import functools

import jax
import jax.numpy as jnp
import numpy as np
from jax import lax
from jax.experimental import pallas as pl
from jax.experimental.pallas import tpu as pltpu


_MASK_VALUE = -1e30          # large finite negative (avoids -inf - -inf NaNs)
_ROPE_THETA = 10000.0
_FALLBACK_VMEM_LIMIT = 48 * 1024 * 1024   # safe on every generation (v7x: 64 MiB)


def _default_vmem_limit():
    """Generation-aware scoped-VMEM limit (~75% of physical, capped at 100 MiB)."""
    try:
        cap = pltpu.get_tpu_info().vmem_capacity_bytes
        return min(int(cap) * 3 // 4, 100 * 1024 * 1024)
    except Exception:
        return _FALLBACK_VMEM_LIMIT


def _choose_block(total, target):
    """Largest divisor of `total` <= target, preferring 256/128/8-multiples."""
    best, best_key = total, (-1, -1)
    for blk in range(1, min(total, target) + 1):
        if total % blk:
            continue
        if blk % 256 == 0:
            a = 3
        elif blk % 128 == 0:
            a = 2
        elif blk % 8 == 0:
            a = 1
        else:
            a = 0
        if (a, blk) > best_key:
            best_key, best = (a, blk), blk
    return best


def _weight_spec(block_shape, index_map, single_buffer):
    # Constant-index weights: one VMEM buffer is enough (index never changes),
    # halving their VMEM footprint.  Only enabled for large C so tiny configs
    # keep the default (proven) pipelining.
    if single_buffer:
        return pl.BlockSpec(block_shape, index_map, pipeline_mode=pl.Buffered(1))
    return pl.BlockSpec(block_shape, index_map)


# --------------------------------------------------------------------------
# Kernel 1: fused QKV projection + RMSNorm(q,k) + RoPE(q,k)
#   x tile (Tb, C)  ->  q/k/v head-major tiles (H, Tb, Dh)
# --------------------------------------------------------------------------
def _qkv_kernel(x_ref, wq_ref, wk_ref, wv_ref, qg_ref, kg_ref, cos_ref, sin_ref,
                q_ref, k_ref, v_ref, *, num_heads, head_dim, eps, compute_dtype):
    H, Dh = num_heads, head_dim
    half = Dh // 2
    C = H * Dh
    inv_c = 1.0 / C

    x = x_ref[...].astype(compute_dtype)                 # (Tb, C)
    cos = cos_ref[...]                                   # (Tb, Dh) f32
    sin = sin_ref[...]                                   # (Tb, Dh) f32, sign-folded

    def project(w_ref):
        # single lane-dense (Tb,C)@(C,C) matmul, f32 accumulation on the MXU
        return jnp.dot(x, w_ref[...], preferred_element_type=jnp.float32)

    def rms_norm(z, g_ref):
        # RMSNorm over the *full* channel dim C (== nn.RMSNorm(dim, dim)).
        ms = jnp.sum(z * z, axis=-1, keepdims=True) * inv_c
        return z * lax.rsqrt(ms + eps) * g_ref[...]      # gamma (1, C), scale folded

    def rope(zh):
        # zh (Tb, Dh) is de-interleaved (evens | odds) by the host-side weight
        # permutation, so rotate_half is a contiguous half/half swap; the
        # first-half minus sign lives in the sin table.
        if Dh % 128 == 0:
            swapped = pltpu.roll(zh, half, axis=-1)      # XLU slot (free-ish)
        else:
            swapped = jnp.concatenate([zh[:, half:], zh[:, :half]], axis=-1)
        return zh * cos + swapped * sin

    def store_heads(out_ref, z, with_rope):
        # static per-head lane slices; stores go out head-major (H, Tb, Dh)
        for h in range(H):
            zh = z[:, h * Dh:(h + 1) * Dh]
            if with_rope:
                zh = rope(zh)
            out_ref[h, :, :] = zh.astype(out_ref.dtype)

    store_heads(q_ref, rms_norm(project(wq_ref), qg_ref), True)
    store_heads(k_ref, rms_norm(project(wk_ref), kg_ref), True)
    store_heads(v_ref, project(wv_ref), False)


# --------------------------------------------------------------------------
# Kernel 2: flash-style attention (online softmax) + fused output projection
#   grid = (B, q_tiles, kv_tiles);  kv axis is the ("arbitrary") reduction.
# --------------------------------------------------------------------------
def _flash_kernel(q_ref, k_ref, v_ref, wo_ref, o_ref, m_s, l_s, acc_s,
                  *, causal, block_q, block_k, num_heads, compute_dtype,
                  exp_dtype, approx_recip):
    qi = pl.program_id(1)
    ki = pl.program_id(2)
    nk = pl.num_programs(2)

    @pl.when(ki == 0)
    def _init():
        m_s[...] = jnp.full(m_s.shape, -jnp.inf, m_s.dtype)
        l_s[...] = jnp.zeros(l_s.shape, l_s.dtype)
        acc_s[...] = jnp.zeros(acc_s.shape, acc_s.dtype)

    def _update(apply_mask):
        # head-batched scores (H, TQ, TK); 1/sqrt(Dh) is folded into q's gamma
        s = jnp.einsum('hqd,hkd->hqk', q_ref[...], k_ref[...],
                       preferred_element_type=jnp.float32)
        if apply_mask:
            row = qi * block_q + lax.broadcasted_iota(jnp.int32,
                                                      (block_q, block_k), 0)
            col = ki * block_k + lax.broadcasted_iota(jnp.int32,
                                                      (block_q, block_k), 1)
            s = jnp.where((col <= row)[None, :, :], s, _MASK_VALUE)

        m_prev = m_s[...]                                 # (H, TQ, 1)
        m_new = jnp.maximum(m_prev, jnp.max(s, axis=-1, keepdims=True))
        alpha = jnp.exp(m_prev - m_new)
        p = jnp.exp((s - m_new).astype(exp_dtype))        # bf16 EUP on v6e/v7x path
        l_s[...] = alpha * l_s[...] + jnp.sum(p, axis=-1, keepdims=True,
                                              dtype=jnp.float32)
        pv = jnp.einsum('hqk,hkd->hqd', p.astype(compute_dtype), v_ref[...],
                        preferred_element_type=jnp.float32)
        acc_s[...] = alpha * acc_s[...] + pv
        m_s[...] = m_new

    if causal:
        q_start = qi * block_q
        q_end = q_start + (block_q - 1)
        k_start = ki * block_k
        k_end = k_start + (block_k - 1)
        # fully-past kv tiles: no mask work at all
        pl.when(k_end <= q_start)(lambda: _update(False))
        # tiles straddling the diagonal: masked path
        pl.when(jnp.logical_and(k_end > q_start, k_start <= q_end))(
            lambda: _update(True))
        # fully-future tiles: skipped; their K/V DMA is elided by the clamped
        # index_map in the wrapper.
    else:
        _update(False)

    @pl.when(ki == nk - 1)
    def _finalize():
        o3 = acc_s[...] * pl.reciprocal(l_s[...], approx=approx_recip)  # (H,TQ,Dh)
        o3 = o3.astype(compute_dtype)
        # fused output projection without an (H, TQ, C) intermediate:
        # accumulate H small matmuls into one (TQ, C) f32 register value.
        out = jnp.zeros(o_ref.shape, jnp.float32)
        for h in range(num_heads):
            out = out + jnp.dot(o3[h], wo_ref[h],
                                preferred_element_type=jnp.float32)
        o_ref[...] = out.astype(o_ref.dtype)


# --------------------------------------------------------------------------
# Host-side wrapper
# --------------------------------------------------------------------------
def attention_forward(x, wq, wk, wv, wo, q_gamma, k_gamma, *, num_heads,
                      causal=False, compute_dtype=jnp.bfloat16,
                      block_t=None, block_q=None, block_k=None,
                      vmem_limit_bytes=None, bf16_exp=None,
                      single_buffer_weights=None):
    """x: (B, T, C) float32. wq/wk/wv/wo: PyTorch-style (out, in) weights."""
    B, T, C = x.shape
    assert C % num_heads == 0
    H = num_heads
    Dh = C // H
    assert Dh % 2 == 0, "RoPE needs an even head_dim"
    scale = Dh ** (-0.5)
    eps = float(C)                      # nn.RMSNorm(dim, dim) -> eps == dim

    compute_dtype = jnp.dtype(compute_dtype)
    approx_recip = compute_dtype != jnp.dtype(jnp.float32)
    if bf16_exp is None:
        # bf16 exp halves EUP occupancy on v6e/v7x; v5e users can pass False.
        bf16_exp = compute_dtype == jnp.dtype(jnp.bfloat16)
    exp_dtype = jnp.bfloat16 if bf16_exp else jnp.float32

    if vmem_limit_bytes is None:
        vmem_limit_bytes = _default_vmem_limit()
    big_vmem = vmem_limit_bytes >= 80 * 1024 * 1024
    tgt = 512 if big_vmem else 256       # 512 on 128-MiB parts, 256 on v7x
    block_t = _choose_block(T, tgt if block_t is None else block_t)
    block_q = _choose_block(T, tgt if block_q is None else block_q)
    block_k = _choose_block(T, tgt if block_k is None else block_k)

    if single_buffer_weights is None:
        single_buffer_weights = C >= 512

    # ---- host-side weight re-layout (free at runtime) ---------------------
    # De-interleave the RoPE pair layout of the q/k projection output channels
    # (per head: evens first, then odds) so the in-kernel rotate_half is a
    # contiguous half/half swap.  The same permutation is applied to both q
    # and k (and the gammas), so scores -- and hence outputs -- are unchanged.
    perm_head = np.concatenate([np.arange(0, Dh, 2), np.arange(1, Dh, 2)])
    perm_full = (np.arange(H)[:, None] * Dh + perm_head[None, :]).reshape(-1)

    wqT = jnp.transpose(wq)[:, perm_full].astype(compute_dtype)      # (C, C)
    wkT = jnp.transpose(wk)[:, perm_full].astype(compute_dtype)      # (C, C)
    wvT = jnp.transpose(wv).astype(compute_dtype)                    # (C, C)
    wo3 = jnp.transpose(wo).reshape(H, Dh, C).astype(compute_dtype)  # (H, Dh, C)

    # fold the 1/sqrt(Dh) attention scale into the q RMSNorm gamma
    qg = (q_gamma[perm_full] * scale).reshape(1, C).astype(jnp.float32)
    kg = k_gamma[perm_full].reshape(1, C).astype(jnp.float32)

    # half/half RoPE tables (T, Dh); the rotate_half sign lives in sin.
    inv_freq = 1.0 / (_ROPE_THETA ** (np.arange(0, Dh, 2, dtype=np.float32) / Dh))
    ang = np.arange(T, dtype=np.float32)[:, None] * inv_freq[None, :]   # (T, Dh/2)
    cos = jnp.asarray(np.concatenate([np.cos(ang), np.cos(ang)], -1), jnp.float32)
    sin = jnp.asarray(np.concatenate([-np.sin(ang), np.sin(ang)], -1), jnp.float32)

    # ---- kernel 1: QKV + RMSNorm + RoPE, head-major (B, H, T, Dh) ---------
    nt = T // block_t
    qkv_kernel = functools.partial(
        _qkv_kernel, num_heads=H, head_dim=Dh, eps=eps,
        compute_dtype=compute_dtype)

    head_out = jax.ShapeDtypeStruct((B, H, T, Dh), compute_dtype)
    head_block = pl.BlockSpec((None, H, block_t, Dh), lambda b, ti: (b, 0, ti, 0))

    q_hbd, k_hbd, v_hbd = pl.pallas_call(
        qkv_kernel,
        out_shape=(head_out, head_out, head_out),
        grid=(B, nt),
        in_specs=[
            pl.BlockSpec((None, block_t, C), lambda b, ti: (b, ti, 0)),       # x
            _weight_spec((C, C), lambda b, ti: (0, 0), single_buffer_weights),
            _weight_spec((C, C), lambda b, ti: (0, 0), single_buffer_weights),
            _weight_spec((C, C), lambda b, ti: (0, 0), single_buffer_weights),
            _weight_spec((1, C), lambda b, ti: (0, 0), single_buffer_weights),
            _weight_spec((1, C), lambda b, ti: (0, 0), single_buffer_weights),
            pl.BlockSpec((block_t, Dh), lambda b, ti: (ti, 0)),               # cos
            pl.BlockSpec((block_t, Dh), lambda b, ti: (ti, 0)),               # sin
        ],
        out_specs=(head_block, head_block, head_block),
        compiler_params=pltpu.CompilerParams(
            dimension_semantics=("parallel", "parallel"),
            vmem_limit_bytes=vmem_limit_bytes),
    )(x, wqT, wkT, wvT, qg, kg, cos, sin)

    # ---- kernel 2: flash attention + fused output projection --------------
    nq = T // block_q
    nkv = T // block_k

    if causal:
        # clamp future kv tiles to the last needed block so their DMA is elided
        def kv_index(b, qi, ki):
            last = (qi * block_q + (block_q - 1)) // block_k
            return (b, 0, jnp.minimum(ki, last), 0)
    else:
        def kv_index(b, qi, ki):
            return (b, 0, ki, 0)

    flash_kernel = functools.partial(
        _flash_kernel, causal=causal, block_q=block_q, block_k=block_k,
        num_heads=H, compute_dtype=compute_dtype, exp_dtype=exp_dtype,
        approx_recip=approx_recip)

    out = pl.pallas_call(
        flash_kernel,
        out_shape=jax.ShapeDtypeStruct((B, T, C), x.dtype),
        grid=(B, nq, nkv),
        in_specs=[
            pl.BlockSpec((None, H, block_q, Dh), lambda b, qi, ki: (b, 0, qi, 0)),
            pl.BlockSpec((None, H, block_k, Dh), kv_index),
            pl.BlockSpec((None, H, block_k, Dh), kv_index),
            _weight_spec((H, Dh, C), lambda b, qi, ki: (0, 0, 0),
                         single_buffer_weights),
        ],
        out_specs=pl.BlockSpec((None, block_q, C), lambda b, qi, ki: (b, qi, 0)),
        scratch_shapes=[
            pltpu.VMEM((H, block_q, 1), jnp.float32),      # running max m
            pltpu.VMEM((H, block_q, 1), jnp.float32),      # running sum l
            pltpu.VMEM((H, block_q, Dh), jnp.float32),     # output accumulator
        ],
        compiler_params=pltpu.CompilerParams(
            dimension_semantics=("parallel", "parallel", "arbitrary"),
            vmem_limit_bytes=vmem_limit_bytes),
    )(q_hbd, k_hbd, v_hbd, wo3)

    # TODO(synk): for head_dim < 128, pack two heads per lane group (or fuse the
    # q projection into the flash prologue on v5e) to densify lanes / cut HBM
    # round-trips; Dh>=128 models are already lane-dense.
    return out


# ---------------------------------------------------------------------------
# plain-JAX reference (mirrors the PyTorch forward) for a correctness check
# ---------------------------------------------------------------------------
def attention_reference(x, wq, wk, wv, wo, q_gamma, k_gamma,
                        *, num_heads, causal=False):
    B, T, C = x.shape
    Dh = C // num_heads
    scale = Dh ** (-0.5)
    eps = float(C)

    def rms(z, g):
        return z * lax.rsqrt(jnp.mean(z * z, -1, keepdims=True) + eps) * g

    q = rms(x @ wq.T, q_gamma)
    k = rms(x @ wk.T, k_gamma)
    v = x @ wv.T

    def split(z):  # (B,T,C) -> (B,H,T,Dh)
        return z.reshape(B, T, num_heads, Dh).transpose(0, 2, 1, 3)

    qh, kh, vh = split(q), split(k), split(v)

    inv_freq = 1.0 / (_ROPE_THETA ** (jnp.arange(0, Dh, 2, dtype=jnp.float32) / Dh))
    ang = jnp.einsum('t,f->tf', jnp.arange(T, dtype=jnp.float32), inv_freq)
    ang = jnp.repeat(ang, 2, axis=-1)                       # interleaved (T, Dh)
    cos, sin = jnp.cos(ang), jnp.sin(ang)

    def rope_interleaved(z):                                # (B, H, T, Dh)
        z1 = z[..., 0::2]
        z2 = z[..., 1::2]
        zr = jnp.stack([-z2, z1], axis=-1).reshape(z.shape)
        return z * cos + zr * sin

    qh = rope_interleaved(qh)
    kh = rope_interleaved(kh)

    s = jnp.einsum('bhqd,bhkd->bhqk', qh, kh) * scale
    if causal:
        mask = jnp.tril(jnp.ones((T, T), bool))
        s = jnp.where(mask, s, -jnp.inf)
    p = jax.nn.softmax(s, axis=-1)
    o = jnp.einsum('bhqk,bhkd->bhqd', p, vh)
    o = o.transpose(0, 2, 1, 3).reshape(B, T, C)
    return o @ wo.T


if __name__ == "__main__":
    B, T, dim, num_heads = 2, 16, 32, 4

    key = jax.random.PRNGKey(0)
    kx, kq, kk, kv, ko = jax.random.split(key, 5)
    x = jax.random.normal(kx, (B, T, dim), dtype=jnp.float32)

    bound = 1.0 / np.sqrt(dim)
    wq = jax.random.uniform(kq, (dim, dim), jnp.float32, -bound, bound)
    wk = jax.random.uniform(kk, (dim, dim), jnp.float32, -bound, bound)
    wv = jax.random.uniform(kv, (dim, dim), jnp.float32, -bound, bound)
    wo = jax.random.uniform(ko, (dim, dim), jnp.float32, -bound, bound)
    q_gamma = jnp.ones((dim,), jnp.float32)    # RMSNorm weight init
    k_gamma = jnp.ones((dim,), jnp.float32)

    ref = attention_reference(x, wq, wk, wv, wo, q_gamma, k_gamma,
                              num_heads=num_heads, causal=False)
    ref_causal = attention_reference(x, wq, wk, wv, wo, q_gamma, k_gamma,
                                     num_heads=num_heads, causal=True)

    # float32 compute path: strict check against the reference
    out_f32 = attention_forward(x, wq, wk, wv, wo, q_gamma, k_gamma,
                                num_heads=num_heads, causal=False,
                                compute_dtype=jnp.float32)
    out_f32 = jax.block_until_ready(out_f32)
    np.testing.assert_allclose(np.asarray(out_f32), np.asarray(ref),
                               rtol=2e-4, atol=2e-4)

    out_f32_c = attention_forward(x, wq, wk, wv, wo, q_gamma, k_gamma,
                                  num_heads=num_heads, causal=True,
                                  compute_dtype=jnp.float32)
    out_f32_c = jax.block_until_ready(out_f32_c)
    np.testing.assert_allclose(np.asarray(out_f32_c), np.asarray(ref_causal),
                               rtol=2e-4, atol=2e-4)

    # multi-tile causal run (exercises past / straddle / skipped-future tiles
    # and the clamped K/V index map)
    out_f32_c2 = attention_forward(x, wq, wk, wv, wo, q_gamma, k_gamma,
                                   num_heads=num_heads, causal=True,
                                   compute_dtype=jnp.float32,
                                   block_q=8, block_k=8)
    out_f32_c2 = jax.block_until_ready(out_f32_c2)
    np.testing.assert_allclose(np.asarray(out_f32_c2), np.asarray(ref_causal),
                               rtol=2e-4, atol=2e-4)

    # default bf16 fast path (bf16 MXU inputs / bf16 exp, f32 accumulation)
    out_bf16 = attention_forward(x, wq, wk, wv, wo, q_gamma, k_gamma,
                                 num_heads=num_heads, causal=False)
    out_bf16 = jax.block_until_ready(out_bf16)
    np.testing.assert_allclose(np.asarray(out_bf16), np.asarray(ref),
                               rtol=5e-2, atol=5e-2)

    print("KERNEL_OK")
</pallas_src>

<mosaic_0001>
module attributes {stable_mosaic.version = 11 : i64} {
  func.func @_qkv_kernel(%arg0: i32, %arg1: i32, %arg2: memref<1x16x32xf32, #tpu.memory_space<vmem>>, %arg3: memref<32x32xf32, #tpu.memory_space<vmem>>, %arg4: memref<32x32xf32, #tpu.memory_space<vmem>>, %arg5: memref<32x32xf32, #tpu.memory_space<vmem>>, %arg6: memref<1x32xf32, #tpu.memory_space<vmem>>, %arg7: memref<1x32xf32, #tpu.memory_space<vmem>>, %arg8: memref<16x8xf32, #tpu.memory_space<vmem>>, %arg9: memref<16x8xf32, #tpu.memory_space<vmem>>, %arg10: memref<1x4x16x8xf32, #tpu.memory_space<vmem>>, %arg11: memref<1x4x16x8xf32, #tpu.memory_space<vmem>>, %arg12: memref<1x4x16x8xf32, #tpu.memory_space<vmem>>) attributes {dimension_semantics = [#tpu.dimension_semantics<parallel>, #tpu.dimension_semantics<parallel>], iteration_bounds = array<i64: 2, 1>, scalar_prefetch = 0 : i64, scratch_operands = 0 : i64, tpu.core_type = #tpu.core_type<tc>, window_params = [{transform_indices = @transform_0, window_bounds = array<i64: 1, 16, 32>}, {pipeline_mode = #tpu.pipeline_mode<synchronous>, transform_indices = @transform_1, window_bounds = array<i64: 32, 32>}, {pipeline_mode = #tpu.pipeline_mode<synchronous>, transform_indices = @transform_2, window_bounds = array<i64: 32, 32>}, {pipeline_mode = #tpu.pipeline_mode<synchronous>, transform_indices = @transform_3, window_bounds = array<i64: 32, 32>}, {pipeline_mode = #tpu.pipeline_mode<synchronous>, transform_indices = @transform_4, window_bounds = array<i64: 1, 32>}, {pipeline_mode = #tpu.pipeline_mode<synchronous>, transform_indices = @transform_5, window_bounds = array<i64: 1, 32>}, {transform_indices = @transform_6, window_bounds = array<i64: 16, 8>}, {transform_indices = @transform_7, window_bounds = array<i64: 16, 8>}, {transform_indices = @transform_8, window_bounds = array<i64: 1, 4, 16, 8>}, {transform_indices = @transform_9, window_bounds = array<i64: 1, 4, 16, 8>}, {transform_indices = @transform_10, window_bounds = array<i64: 1, 4, 16, 8>}]} {
    %c0 = arith.constant 0 : index
    %c0_0 = arith.constant 0 : index
    %c0_1 = arith.constant 0 : index
    %0 = vector.load %arg2[%c0, %c0_0, %c0_1] : memref<1x16x32xf32, #tpu.memory_space<vmem>>, vector<1x16x32xf32>
    %1 = vector.shape_cast %0 : vector<1x16x32xf32> to vector<16x32xf32>
    %c0_2 = arith.constant 0 : index
    %c0_3 = arith.constant 0 : index
    %2 = vector.load %arg8[%c0_2, %c0_3] : memref<16x8xf32, #tpu.memory_space<vmem>>, vector<16x8xf32>
    %c0_4 = arith.constant 0 : index
    %c0_5 = arith.constant 0 : index
    %3 = vector.load %arg9[%c0_4, %c0_5] : memref<16x8xf32, #tpu.memory_space<vmem>>, vector<16x8xf32>
    %c0_6 = arith.constant 0 : index
    %c0_7 = arith.constant 0 : index
    %4 = vector.load %arg3[%c0_6, %c0_7] : memref<32x32xf32, #tpu.memory_space<vmem>>, vector<32x32xf32>
    %cst = arith.constant dense<0.000000e+00> : vector<16x32xf32>
    %5 = tpu.matmul %1, %4, %cst {dimension_numbers = #tpu.dot_dimension_numbers<[1], [0], [0], [1], [0, 0, 1, 1], [], []>} : vector<16x32xf32>, vector<32x32xf32>, vector<16x32xf32> -> vector<16x32xf32>
    %6 = arith.mulf %5, %5 : vector<16x32xf32>
    %cst_8 = arith.constant dense<0.000000e+00> : vector<16xf32>
    %7 = vector.multi_reduction <add>, %6, %cst_8 [1] : vector<16x32xf32> to vector<16xf32>
    %8 = vector.shape_cast %7 : vector<16xf32> to vector<16x1xf32>
    %cst_9 = arith.constant 3.125000e-02 : f32
    %9 = vector.broadcast %cst_9 : f32 to vector<16x1xf32>
    %10 = arith.mulf %8, %9 : vector<16x1xf32>
    %cst_10 = arith.constant 3.200000e+01 : f32
    %11 = vector.broadcast %cst_10 : f32 to vector<16x1xf32>
    %12 = arith.addf %10, %11 : vector<16x1xf32>
    %13 = math.rsqrt %12 : vector<16x1xf32>
    %14 = vector.broadcast %13 : vector<16x1xf32> to vector<16x32xf32>
    %15 = arith.mulf %5, %14 : vector<16x32xf32>
    %c0_11 = arith.constant 0 : index
    %c0_12 = arith.constant 0 : index
    %16 = vector.load %arg6[%c0_11, %c0_12] : memref<1x32xf32, #tpu.memory_space<vmem>>, vector<1x32xf32>
    %17 = vector.broadcast %16 : vector<1x32xf32> to vector<16x32xf32>
    %18 = arith.mulf %15, %17 : vector<16x32xf32>
    %19 = vector.extract_strided_slice %18 {offsets = [0, 0], sizes = [16, 8], strides = [1, 1]} : vector<16x32xf32> to vector<16x8xf32>
    %20 = vector.extract_strided_slice %19 {offsets = [0, 4], sizes = [16, 4], strides = [1, 1]} : vector<16x8xf32> to vector<16x4xf32>
    %21 = vector.extract_strided_slice %19 {offsets = [0, 0], sizes = [16, 4], strides = [1, 1]} : vector<16x8xf32> to vector<16x4xf32>
    %22 = tpu.concatenate %20, %21 in 1 : vector<16x4xf32>, vector<16x4xf32> -> vector<16x8xf32>
    %23 = arith.mulf %19, %2 : vector<16x8xf32>
    %24 = arith.mulf %22, %3 : vector<16x8xf32>
    %25 = arith.addf %23, %24 : vector<16x8xf32>
    %c0_13 = arith.constant 0 : index
    %c0_14 = arith.constant 0 : index
    %c0_15 = arith.constant 0 : index
    %c0_16 = arith.constant 0 : index
    %26 = vector.load %arg10[%c0_13, %c0_14, %c0_15, %c0_16] : memref<1x4x16x8xf32, #tpu.memory_space<vmem>>, vector<1x1x16x8xf32>
    %27 = vector.shape_cast %26 : vector<1x1x16x8xf32> to vector<16x8xf32>
    %28 = vector.shape_cast %25 : vector<16x8xf32> to vector<1x1x16x8xf32>
    tpu.vector_store %arg10[%c0_13, %c0_14, %c0_15, %c0_16], %28 {strides = array<i32>} : memref<1x4x16x8xf32, #tpu.memory_space<vmem>>, vector<1x1x16x8xf32>,
    %29 = vector.extract_strided_slice %18 {offsets = [0, 8], sizes = [16, 8], strides = [1, 1]} : vector<16x32xf32> to vector<16x8xf32>
    %30 = vector.extract_strided_slice %29 {offsets = [0, 4], sizes = [16, 4], strides = [1, 1]} : vector<16x8xf32> to vector<16x4xf32>
    %31 = vector.extract_strided_slice %29 {offsets = [0, 0], sizes = [16, 4], strides = [1, 1]} : vector<16x8xf32> to vector<16x4xf32>
    %32 = tpu.concatenate %30, %31 in 1 : vector<16x4xf32>, vector<16x4xf32> -> vector<16x8xf32>
    %33 = arith.mulf %29, %2 : vector<16x8xf32>
    %34 = arith.mulf %32, %3 : vector<16x8xf32>
    %35 = arith.addf %33, %34 : vector<16x8xf32>
    %c0_17 = arith.constant 0 : index
    %c1 = arith.constant 1 : index
    %c0_18 = arith.constant 0 : index
    %c0_19 = arith.constant 0 : index
    %36 = vector.load %arg10[%c0_17, %c1, %c0_18, %c0_19] : memref<1x4x16x8xf32, #tpu.memory_space<vmem>>, vector<1x1x16x8xf32>
    %37 = vector.shape_cast %36 : vector<1x1x16x8xf32> to vector<16x8xf32>
    %38 = vector.shape_cast %35 : vector<16x8xf32> to vector<1x1x16x8xf32>
    tpu.vector_store %arg10[%c0_17, %c1, %c0_18, %c0_19], %38 {strides = array<i32>} : memref<1x4x16x8xf32, #tpu.memory_space<vmem>>, vector<1x1x16x8xf32>,
    %39 = vector.extract_strided_slice %18 {offsets = [0, 16], sizes = [16, 8], strides = [1, 1]} : vector<16x32xf32> to vector<16x8xf32>
    %40 = vector.extract_strided_slice %39 {offsets = [0, 4], sizes = [16, 4], strides = [1, 1]} : vector<16x8xf32> to vector<16x4xf32>
    %41 = vector.extract_strided_slice %39 {offsets = [0, 0], sizes = [16, 4], strides = [1, 1]} : vector<16x8xf32> to vector<16x4xf32>
    %42 = tpu.concatenate %40, %41 in 1 : vector<16x4xf32>, vector<16x4xf32> -> vector<16x8xf32>
    %43 = arith.mulf %39, %2 : vector<16x8xf32>
    %44 = arith.mulf %42, %3 : vector<16x8xf32>
    %45 = arith.addf %43, %44 : vector<16x8xf32>
    %c0_20 = arith.constant 0 : index
    %c2 = arith.constant 2 : index
    %c0_21 = arith.constant 0 : index
    %c0_22 = arith.constant 0 : index
    %46 = vector.load %arg10[%c0_20, %c2, %c0_21, %c0_22] : memref<1x4x16x8xf32, #tpu.memory_space<vmem>>, vector<1x1x16x8xf32>
    %47 = vector.shape_cast %46 : vector<1x1x16x8xf32> to vector<16x8xf32>
    %48 = vector.shape_cast %45 : vector<16x8xf32> to vector<1x1x16x8xf32>
    tpu.vector_store %arg10[%c0_20, %c2, %c0_21, %c0_22], %48 {strides = array<i32>} : memref<1x4x16x8xf32, #tpu.memory_space<vmem>>, vector<1x1x16x8xf32>,
    %49 = vector.extract_strided_slice %18 {offsets = [0, 24], sizes = [16, 8], strides = [1, 1]} : vector<16x32xf32> to vector<16x8xf32>
    %50 = vector.extract_strided_slice %49 {offsets = [0, 4], sizes = [16, 4], strides = [1, 1]} : vector<16x8xf32> to vector<16x4xf32>
    %51 = vector.extract_strided_slice %49 {offsets = [0, 0], sizes = [16, 4], strides = [1, 1]} : vector<16x8xf32> to vector<16x4xf32>
    %52 = tpu.concatenate %50, %51 in 1 : vector<16x4xf32>, vector<16x4xf32> -> vector<16x8xf32>
    %53 = arith.mulf %49, %2 : vector<16x8xf32>
    %54 = arith.mulf %52, %3 : vector<16x8xf32>
    %55 = arith.addf %53, %54 : vector<16x8xf32>
    %c0_23 = arith.constant 0 : index
    %c3 = arith.constant 3 : index
    %c0_24 = arith.constant 0 : index
    %c0_25 = arith.constant 0 : index
    %56 = vector.load %arg10[%c0_23, %c3, %c0_24, %c0_25] : memref<1x4x16x8xf32, #tpu.memory_space<vmem>>, vector<1x1x16x8xf32>
    %57 = vector.shape_cast %56 : vector<1x1x16x8xf32> to vector<16x8xf32>
    %58 = vector.shape_cast %55 : vector<16x8xf32> to vector<1x1x16x8xf32>
    tpu.vector_store %arg10[%c0_23, %c3, %c0_24, %c0_25], %58 {strides = array<i32>} : memref<1x4x16x8xf32, #tpu.memory_space<vmem>>, vector<1x1x16x8xf32>,
    %c0_26 = arith.constant 0 : index
    %c0_27 = arith.constant 0 : index
    %59 = vector.load %arg4[%c0_26, %c0_27] : memref<32x32xf32, #tpu.memory_space<vmem>>, vector<32x32xf32>
    %cst_28 = arith.constant dense<0.000000e+00> : vector<16x32xf32>
    %60 = tpu.matmul %1, %59, %cst_28 {dimension_numbers = #tpu.dot_dimension_numbers<[1], [0], [0], [1], [0, 0, 1, 1], [], []>} : vector<16x32xf32>, vector<32x32xf32>, vector<16x32xf32> -> vector<16x32xf32>
    %61 = arith.mulf %60, %60 : vector<16x32xf32>
    %cst_29 = arith.constant dense<0.000000e+00> : vector<16xf32>
    %62 = vector.multi_reduction <add>, %61, %cst_29 [1] : vector<16x32xf32> to vector<16xf32>
    %63 = vector.shape_cast %62 : vector<16xf32> to vector<16x1xf32>
    %cst_30 = arith.constant 3.125000e-02 : f32
    %64 = vector.broadcast %cst_30 : f32 to vector<16x1xf32>
    %65 = arith.mulf %63, %64 : vector<16x1xf32>
    %cst_31 = arith.constant 3.200000e+01 : f32
    %66 = vector.broadcast %cst_31 : f32 to vector<16x1xf32>
    %67 = arith.addf %65, %66 : vector<16x1xf32>
    %68 = math.rsqrt %67 : vector<16x1xf32>
    %69 = vector.broadcast %68 : vector<16x1xf32> to vector<16x32xf32>
    %70 = arith.mulf %60, %69 : vector<16x32xf32>
    %c0_32 = arith.constant 0 : index
    %c0_33 = arith.constant 0 : index
    %71 = vector.load %arg7[%c0_32, %c0_33] : memref<1x32xf32, #tpu.memory_space<vmem>>, vector<1x32xf32>
    %72 = vector.broadcast %71 : vector<1x32xf32> to vector<16x32xf32>
    %73 = arith.mulf %70, %72 : vector<16x32xf32>
    %74 = vector.extract_strided_slice %73 {offsets = [0, 0], sizes = [16, 8], strides = [1, 1]} : vector<16x32xf32> to vector<16x8xf32>
    %75 = vector.extract_strided_slice %74 {offsets = [0, 4], sizes = [16, 4], strides = [1, 1]} : vector<16x8xf32> to vector<16x4xf32>
    %76 = vector.extract_strided_slice %74 {offsets = [0, 0], sizes = [16, 4], strides = [1, 1]} : vector<16x8xf32> to vector<16x4xf32>
    %77 = tpu.concatenate %75, %76 in 1 : vector<16x4xf32>, vector<16x4xf32> -> vector<16x8xf32>
    %78 = arith.mulf %74, %2 : vector<16x8xf32>
    %79 = arith.mulf %77, %3 : vector<16x8xf32>
    %80 = arith.addf %78, %79 : vector<16x8xf32>
    %c0_34 = arith.constant 0 : index
    %c0_35 = arith.constant 0 : index
    %c0_36 = arith.constant 0 : index
    %c0_37 = arith.constant 0 : index
    %81 = vector.load %arg11[%c0_34, %c0_35, %c0_36, %c0_37] : memref<1x4x16x8xf32, #tpu.memory_space<vmem>>, vector<1x1x16x8xf32>
    %82 = vector.shape_cast %81 : vector<1x1x16x8xf32> to vector<16x8xf32>
    %83 = vector.shape_cast %80 : vector<16x8xf32> to vector<1x1x16x8xf32>
    tpu.vector_store %arg11[%c0_34, %c0_35, %c0_36, %c0_37], %83 {strides = array<i32>} : memref<1x4x16x8xf32, #tpu.memory_space<vmem>>, vector<1x1x16x8xf32>,
    %84 = vector.extract_strided_slice %73 {offsets = [0, 8], sizes = [16, 8], strides = [1, 1]} : vector<16x32xf32> to vector<16x8xf32>
    %85 = vector.extract_strided_slice %84 {offsets = [0, 4], sizes = [16, 4], strides = [1, 1]} : vector<16x8xf32> to vector<16x4xf32>
    %86 = vector.extract_strided_slice %84 {offsets = [0, 0], sizes = [16, 4], strides = [1, 1]} : vector<16x8xf32> to vector<16x4xf32>
    %87 = tpu.concatenate %85, %86 in 1 : vector<16x4xf32>, vector<16x4xf32> -> vector<16x8xf32>
    %88 = arith.mulf %84, %2 : vector<16x8xf32>
    %89 = arith.mulf %87, %3 : vector<16x8xf32>
    %90 = arith.addf %88, %89 : vector<16x8xf32>
    %c0_38 = arith.constant 0 : index
    %c1_39 = arith.constant 1 : index
    %c0_40 = arith.constant 0 : index
    %c0_41 = arith.constant 0 : index
    %91 = vector.load %arg11[%c0_38, %c1_39, %c0_40, %c0_41] : memref<1x4x16x8xf32, #tpu.memory_space<vmem>>, vector<1x1x16x8xf32>
    %92 = vector.shape_cast %91 : vector<1x1x16x8xf32> to vector<16x8xf32>
    %93 = vector.shape_cast %90 : vector<16x8xf32> to vector<1x1x16x8xf32>
    tpu.vector_store %arg11[%c0_38, %c1_39, %c0_40, %c0_41], %93 {strides = array<i32>} : memref<1x4x16x8xf32, #tpu.memory_space<vmem>>, vector<1x1x16x8xf32>,
    %94 = vector.extract_strided_slice %73 {offsets = [0, 16], sizes = [16, 8], strides = [1, 1]} : vector<16x32xf32> to vector<16x8xf32>
    %95 = vector.extract_strided_slice %94 {offsets = [0, 4], sizes = [16, 4], strides = [1, 1]} : vector<16x8xf32> to vector<16x4xf32>
    %96 = vector.extract_strided_slice %94 {offsets = [0, 0], sizes = [16, 4], strides = [1, 1]} : vector<16x8xf32> to vector<16x4xf32>
    %97 = tpu.concatenate %95, %96 in 1 : vector<16x4xf32>, vector<16x4xf32> -> vector<16x8xf32>
    %98 = arith.mulf %94, %2 : vector<16x8xf32>
    %99 = arith.mulf %97, %3 : vector<16x8xf32>
    %100 = arith.addf %98, %99 : vector<16x8xf32>
    %c0_42 = arith.constant 0 : index
    %c2_43 = arith.constant 2 : index
    %c0_44 = arith.constant 0 : index
    %c0_45 = arith.constant 0 : index
    %101 = vector.load %arg11[%c0_42, %c2_43, %c0_44, %c0_45] : memref<1x4x16x8xf32, #tpu.memory_space<vmem>>, vector<1x1x16x8xf32>
    %102 = vector.shape_cast %101 : vector<1x1x16x8xf32> to vector<16x8xf32>
    %103 = vector.shape_cast %100 : vector<16x8xf32> to vector<1x1x16x8xf32>
    tpu.vector_store %arg11[%c0_42, %c2_43, %c0_44, %c0_45], %103 {strides = array<i32>} : memref<1x4x16x8xf32, #tpu.memory_space<vmem>>, vector<1x1x16x8xf32>,
    %104 = vector.extract_strided_slice %73 {offsets = [0, 24], sizes = [16, 8], strides = [1, 1]} : vector<16x32xf32> to vector<16x8xf32>
    %105 = vector.extract_strided_slice %104 {offsets = [0, 4], sizes = [16, 4], strides = [1, 1]} : vector<16x8xf32> to vector<16x4xf32>
    %106 = vector.extract_strided_slice %104 {offsets = [0, 0], sizes = [16, 4], strides = [1, 1]} : vector<16x8xf32> to vector<16x4xf32>
    %107 = tpu.concatenate %105, %106 in 1 : vector<16x4xf32>, vector<16x4xf32> -> vector<16x8xf32>
    %108 = arith.mulf %104, %2 : vector<16x8xf32>
    %109 = arith.mulf %107, %3 : vector<16x8xf32>
    %110 = arith.addf %108, %109 : vector<16x8xf32>
    %c0_46 = arith.constant 0 : index
    %c3_47 = arith.constant 3 : index
    %c0_48 = arith.constant 0 : index
    %c0_49 = arith.constant 0 : index
    %111 = vector.load %arg11[%c0_46, %c3_47, %c0_48, %c0_49] : memref<1x4x16x8xf32, #tpu.memory_space<vmem>>, vector<1x1x16x8xf32>
    %112 = vector.shape_cast %111 : vector<1x1x16x8xf32> to vector<16x8xf32>
    %113 = vector.shape_cast %110 : vector<16x8xf32> to vector<1x1x16x8xf32>
    tpu.vector_store %arg11[%c0_46, %c3_47, %c0_48, %c0_49], %113 {strides = array<i32>} : memref<1x4x16x8xf32, #tpu.memory_space<vmem>>, vector<1x1x16x8xf32>,
    %c0_50 = arith.constant 0 : index
    %c0_51 = arith.constant 0 : index
    %114 = vector.load %arg5[%c0_50, %c0_51] : memref<32x32xf32, #tpu.memory_space<vmem>>, vector<32x32xf32>
    %cst_52 = arith.constant dense<0.000000e+00> : vector<16x32xf32>
    %115 = tpu.matmul %1, %114, %cst_52 {dimension_numbers = #tpu.dot_dimension_numbers<[1], [0], [0], [1], [0, 0, 1, 1], [], []>} : vector<16x32xf32>, vector<32x32xf32>, vector<16x32xf32> -> vector<16x32xf32>
    %116 = vector.extract_strided_slice %115 {offsets = [0, 0], sizes = [16, 8], strides = [1, 1]} : vector<16x32xf32> to vector<16x8xf32>
    %c0_53 = arith.constant 0 : index
    %c0_54 = arith.constant 0 : index
    %c0_55 = arith.constant 0 : index
    %c0_56 = arith.constant 0 : index
    %117 = vector.load %arg12[%c0_53, %c0_54, %c0_55, %c0_56] : memref<1x4x16x8xf32, #tpu.memory_space<vmem>>, vector<1x1x16x8xf32>
    %118 = vector.shape_cast %117 : vector<1x1x16x8xf32> to vector<16x8xf32>
    %119 = vector.shape_cast %116 : vector<16x8xf32> to vector<1x1x16x8xf32>
    tpu.vector_store %arg12[%c0_53, %c0_54, %c0_55, %c0_56], %119 {strides = array<i32>} : memref<1x4x16x8xf32, #tpu.memory_space<vmem>>, vector<1x1x16x8xf32>,
    %120 = vector.extract_strided_slice %115 {offsets = [0, 8], sizes = [16, 8], strides = [1, 1]} : vector<16x32xf32> to vector<16x8xf32>
    %c0_57 = arith.constant 0 : index
    %c1_58 = arith.constant 1 : index
    %c0_59 = arith.constant 0 : index
    %c0_60 = arith.constant 0 : index
    %121 = vector.load %arg12[%c0_57, %c1_58, %c0_59, %c0_60] : memref<1x4x16x8xf32, #tpu.memory_space<vmem>>, vector<1x1x16x8xf32>
    %122 = vector.shape_cast %121 : vector<1x1x16x8xf32> to vector<16x8xf32>
    %123 = vector.shape_cast %120 : vector<16x8xf32> to vector<1x1x16x8xf32>
    tpu.vector_store %arg12[%c0_57, %c1_58, %c0_59, %c0_60], %123 {strides = array<i32>} : memref<1x4x16x8xf32, #tpu.memory_space<vmem>>, vector<1x1x16x8xf32>,
    %124 = vector.extract_strided_slice %115 {offsets = [0, 16], sizes = [16, 8], strides = [1, 1]} : vector<16x32xf32> to vector<16x8xf32>
    %c0_61 = arith.constant 0 : index
    %c2_62 = arith.constant 2 : index
    %c0_63 = arith.constant 0 : index
    %c0_64 = arith.constant 0 : index
    %125 = vector.load %arg12[%c0_61, %c2_62, %c0_63, %c0_64] : memref<1x4x16x8xf32, #tpu.memory_space<vmem>>, vector<1x1x16x8xf32>
    %126 = vector.shape_cast %125 : vector<1x1x16x8xf32> to vector<16x8xf32>
    %127 = vector.shape_cast %124 : vector<16x8xf32> to vector<1x1x16x8xf32>
    tpu.vector_store %arg12[%c0_61, %c2_62, %c0_63, %c0_64], %127 {strides = array<i32>} : memref<1x4x16x8xf32, #tpu.memory_space<vmem>>, vector<1x1x16x8xf32>,
    %128 = vector.extract_strided_slice %115 {offsets = [0, 24], sizes = [16, 8], strides = [1, 1]} : vector<16x32xf32> to vector<16x8xf32>
    %c0_65 = arith.constant 0 : index
    %c3_66 = arith.constant 3 : index
    %c0_67 = arith.constant 0 : index
    %c0_68 = arith.constant 0 : index
    %129 = vector.load %arg12[%c0_65, %c3_66, %c0_67, %c0_68] : memref<1x4x16x8xf32, #tpu.memory_space<vmem>>, vector<1x1x16x8xf32>
    %130 = vector.shape_cast %129 : vector<1x1x16x8xf32> to vector<16x8xf32>
    %131 = vector.shape_cast %128 : vector<16x8xf32> to vector<1x1x16x8xf32>
    tpu.vector_store %arg12[%c0_65, %c3_66, %c0_67, %c0_68], %131 {strides = array<i32>} : memref<1x4x16x8xf32, #tpu.memory_space<vmem>>, vector<1x1x16x8xf32>,
    return
  }
  func.func @transform_0(%arg0: i32, %arg1: i32) -> (i32, i32, i32) {
    %c0_i32 = arith.constant 0 : i32
    %c0_i32_0 = arith.constant 0 : i32
    return %arg0, %arg1, %c0_i32 : i32, i32, i32
  }
  func.func @transform_1(%arg0: i32, %arg1: i32) -> (i32, i32) {
    %c0_i32 = arith.constant 0 : i32
    %c0_i32_0 = arith.constant 0 : i32
    %c0_i32_1 = arith.constant 0 : i32
    return %c0_i32, %c0_i32_0 : i32, i32
  }
  func.func @transform_2(%arg0: i32, %arg1: i32) -> (i32, i32) {
    %c0_i32 = arith.constant 0 : i32
    %c0_i32_0 = arith.constant 0 : i32
    %c0_i32_1 = arith.constant 0 : i32
    return %c0_i32, %c0_i32_0 : i32, i32
  }
  func.func @transform_3(%arg0: i32, %arg1: i32) -> (i32, i32) {
    %c0_i32 = arith.constant 0 : i32
    %c0_i32_0 = arith.constant 0 : i32
    %c0_i32_1 = arith.constant 0 : i32
    return %c0_i32, %c0_i32_0 : i32, i32
  }
  func.func @transform_4(%arg0: i32, %arg1: i32) -> (i32, i32) {
    %c0_i32 = arith.constant 0 : i32
    %c0_i32_0 = arith.constant 0 : i32
    %c0_i32_1 = arith.constant 0 : i32
    return %c0_i32, %c0_i32_0 : i32, i32
  }
  func.func @transform_5(%arg0: i32, %arg1: i32) -> (i32, i32) {
    %c0_i32 = arith.constant 0 : i32
    %c0_i32_0 = arith.constant 0 : i32
    %c0_i32_1 = arith.constant 0 : i32
    return %c0_i32, %c0_i32_0 : i32, i32
  }
  func.func @transform_6(%arg0: i32, %arg1: i32) -> (i32, i32) {
    %c0_i32 = arith.constant 0 : i32
    %c0_i32_0 = arith.constant 0 : i32
    return %arg1, %c0_i32 : i32, i32
  }
  func.func @transform_7(%arg0: i32, %arg1: i32) -> (i32, i32) {
    %c0_i32 = arith.constant 0 : i32
    %c0_i32_0 = arith.constant 0 : i32
    return %arg1, %c0_i32 : i32, i32
  }
  func.func @transform_8(%arg0: i32, %arg1: i32) -> (i32, i32, i32, i32) {
    %c0_i32 = arith.constant 0 : i32
    %c0_i32_0 = arith.constant 0 : i32
    %c0_i32_1 = arith.constant 0 : i32
    return %arg0, %c0_i32, %arg1, %c0_i32_0 : i32, i32, i32, i32
  }
  func.func @transform_9(%arg0: i32, %arg1: i32) -> (i32, i32, i32, i32) {
    %c0_i32 = arith.constant 0 : i32
    %c0_i32_0 = arith.constant 0 : i32
    %c0_i32_1 = arith.constant 0 : i32
    return %arg0, %c0_i32, %arg1, %c0_i32_0 : i32, i32, i32, i32
  }
  func.func @transform_10(%arg0: i32, %arg1: i32) -> (i32, i32, i32, i32) {
    %c0_i32 = arith.constant 0 : i32
    %c0_i32_0 = arith.constant 0 : i32
    %c0_i32_1 = arith.constant 0 : i32
    return %arg0, %c0_i32, %arg1, %c0_i32_0 : i32, i32, i32, i32
  }
}

</mosaic_0001>

<bundles_post_ra>
// kernel: tpu_custom_call.1
= control target key start
LH: loop header
LB: loop body
LE: loop exit
PB: predicated region body
PF: predicated region fallthrough
CT: control target
= control target key end

     0   :  { %16 = vsyncpa [#allocation3], 0  ;;  %s2107_s0 = inlined_call_operand.vmem [shape: f32[2,16,32], index: 0, kind: input, shape index: {}]   ;;  %s2108_s1 = inlined_call_operand.hbm [shape: f32[32,32], index: 1, kind: input, shape index: {}]   ;;  %s2109_s2 = inlined_call_operand.hbm [shape: f32[32,32], index: 2, kind: input, shape index: {}]   ;;  %s2110_s3 = inlined_call_operand.hbm [shape: f32[32,32], index: 3, kind: input, shape index: {}]   ;;  %s2111_s4 = inlined_call_operand.vmem [shape: f32[1,32], index: 4, kind: input, shape index: {}]   ;;  %s2112_s5 = inlined_call_operand.vmem [shape: f32[1,32], index: 5, kind: input, shape index: {}]   ;;  %s2113_s6 = inlined_call_operand.vmem [shape: f32[16,8], index: 6, kind: input, shape index: {}]   ;;  %s2114_s7 = inlined_call_operand.vmem [shape: f32[16,8], index: 7, kind: input, shape index: {}]   ;;  %s2115_s8 = inlined_call_operand.vmem [shape: f32[2,4,16,8], index: 8, kind: output, shape index: {0}]   ;;  %s2116_s9 = inlined_call_operand.vmem [shape: f32[2,4,16,8], index: 9, kind: output, shape index: {1}]   ;;  %s2117_s10 = inlined_call_operand.vmem [shape: f32[2,4,16,8], index: 10, kind: output, shape index: {2}]  }
   0x1   :  { %17 = vsyncpa [#allocation5], 0  ;;  %s1742_s13 = smov 0   ;;  %s1744_s14 = smov 0  }
   0x2   :  { %s1746_s15 = smov 0  }
   0x3 LB: > { %s1381_s16 = sadd.s32 4294967295, %s1669_s15   ;;  %p1383_p0 = scmp.ge.s32.totalorder %s1669_s15, 1  ;;  %s1669_s15 = sphi %s1746_s15, %s23_s15   ;;  %s1665_s14 = sphi %s1744_s14, %s2123_s14   ;;  %s1661_s13 = sphi %s1742_s13, %s2122_s13  }
   0x4   : > { %p309_p1 = scmp.lt.s32.totalorder %s1669_s15, 3  ;;  %p1760_p2 = scmp.eq.s32.totalorder %s1381_s16, 0 }
   0x5   : > { %s1671_s19 = smov [#allocation4]   ;;  %s35_s22 = sadd.s32 1, %s1665_s14 }
   0x6   : > { %p1764_p3 = pnand %p1383_p0, %p309_p1  ;;  %s334_s20 = sshll.u32 %s1671_s19, 4  ;;  %s335_s20 = int_to_ptr.vmem [resolvable:$true] %s334_s20 }
   0x7   : > { %p1777_p6 = scmp.ge.s32.totalorder %s35_s22, 2  ;;  %s1672_s24 = smov [#allocation2]  }
   0x8   : > { %p1497_p4 = pneg %p1764_p3  ;;  %s321_s25 = sshll.u32 %s1672_s24, 4  ;;  %s322_s25 = int_to_ptr.vmem [resolvable:$true] %s321_s25 }
   0x9   : > { %s1572_s26 = scalar_lea.vmem %s335_s20, 512  ;;  %p1580_p11 = scmp.lt.s32.totalorder %s335_s20, %s335_s20 }
   0xa   : > { %p1772_p5 = pnand %p1760_p2, %p1497_p4  ;;  %p1573_p8 = scmp.ne.s32.totalorder %s335_s20, %s1572_s26 }
   0xb   : > { %p1581_p12 = scmp.lt.s32.totalorder %s1572_s26, %s1572_s26 }
   0xc   : > { %p1563_p7 = pneg %p1772_p5 }
   0xd   : > { %p1582_p13 = por %p1581_p12, %p1580_p11 }
   0xe   : > { %p1575_p9 = pnand %p1573_p8, %p1563_p7 }
  0x10   : > { %p1576_p10 = pneg %p1575_p9 }
  0x12   : > { %p1583_p0 = pnand %p1582_p13, %p1576_p10 }
  0x14   : > { %1586 = shalt.err (!%p1583_p0)
}
  0x15   : > { %s1673_s27 = smov 128   ;;  %s1674_s28 = smov 8  }
  0x16   : > { %1503 = dma.hbm_to_vmem [thread:$0]  (!%p1772_p5), %s2109_s2, 512, %s335_s20, [#allocation5], %s1673_s27, %s1673_s27, %s1674_s28  }
  0x17   : > { %s2125_s22 = smov (%p1777_p6, %s35_s22), 0  ;;  %s1598_s11 = scalar_lea.vmem %s322_s25, 512 }
  0x18   : > { %p1599_p1 = scmp.ne.s32.totalorder %s322_s25, %s1598_s11  ;;  %p1606_p9 = scmp.lt.s32.totalorder %s322_s25, %s322_s25 }
  0x19   : > { %p1607_p10 = scmp.lt.s32.totalorder %s1598_s11, %s1598_s11 }
  0x1a   : > { %p1601_p4 = pnand %p1599_p1, %p1563_p7 }
  0x1b   : > { %p1608_p11 = por %p1607_p10, %p1606_p9 }
  0x1c   : > { %p1602_p8 = pneg %p1601_p4 }
  0x1e   : > { %p1609_p12 = pnand %p1608_p11, %p1602_p8 }
  0x20   : > { %1612 = shalt.err (!%p1609_p12)
}
  0x21   : > { %1500 = dma.hbm_to_vmem [thread:$0]  (!%p1772_p5), %s2108_s1, 512, %s322_s25, [#allocation3], %s1673_s27, %s1673_s27, %s1674_s28  }
  0x22   : > { %s1675_s19 = smov [#allocation6]  }
  0x23   : > { %s347_s20 = sshll.u32 %s1675_s19, 4  ;;  %s348_s20 = int_to_ptr.vmem [resolvable:$true] %s347_s20 }
  0x24   : > { %s1624_s23 = scalar_lea.vmem %s348_s20, 512  ;;  %p1632_p1 = scmp.lt.s32.totalorder %s348_s20, %s348_s20 }
  0x25   : > { %p1625_p6 = scmp.ne.s32.totalorder %s348_s20, %s1624_s23  ;;  %p1633_p4 = scmp.lt.s32.totalorder %s1624_s23, %s1624_s23 }
  0x27   : > { %p1627_p13 = pnand %p1625_p6, %p1563_p7  ;;  %p1634_p8 = por %p1633_p4, %p1632_p1 }
  0x29   : > { %p1628_p0 = pneg %p1627_p13 }
  0x2b   : > { %p1635_p9 = pnand %p1634_p8, %p1628_p0 }
  0x2d   : > { %1638 = shalt.err (!%p1635_p9)
}
  0x2e   : > { %1506 = dma.hbm_to_vmem [thread:$0]  (!%p1772_p5), %s2110_s3, 512, %s348_s20, [#allocation5], %s1673_s27, %s1673_s27, %s1674_s28  }
  0x2f   : > { %400 = sbr.rel (%p1764_p3) target bundleno = 830 (0x33e), region = 52 }
  0x34   : > { %1652 = dma.done.wait (%p1760_p2), [#allocation3], 512  }
  0x35   : > { %1654 = vsyncadd (%p1760_p2), [#allocation3], 4294966784 }
  0x36   : > { %1656 = dma.done.wait (%p1760_p2), [#allocation5], 1024  }
  0x37   : > { %1658 = vsyncadd (%p1760_p2), [#allocation5], 4294966272  ;;  %p483_p7 = scmp.lt.s32.totalorder %s1661_s13, 1  ;;  %v543_v0 = vld [vmem:[#allocation2 + $0x18] sm:$0xff]  ;;  %v542_v2 = vld [vmem:[#allocation2 + $0x10] sm:$0xff]  ;;  %vm544_vm0 = vcmask 261120  }
  0x38   : > { %v799_v1 = vld [vmem:[#allocation4 + $0x18] sm:$0xff]  ;;  %1452 = vmatprep.subr.mxu0 %v543_v0  ;;  %v798_v3 = vld [vmem:[#allocation4 + $0x10] sm:$0xff]  ;;  %v541_v4 = vld [vmem:[#allocation2 + $0x8] sm:$0xff]  ;;  %s1676_s29 = smov 124   ;;  %s1677_s30 = smov 108   ;;  %vm674_vm1 = vcmask 64512  }
  0x39   : > { %s2127_s13 = smov (!%p483_p7, %s1661_s13), 1  ;;  %1463 = vmatprep.subr.mxu1 %v799_v1  ;;  %1453 = vmatpush3.msra.mxu0 %v543_v0  ;;  %v797_v5 = vld [vmem:[#allocation4 + $0x8] sm:$0xff]  ;;  %v540_v6 = vld [vmem:[#allocation2] sm:$0xff]  ;;  %v1026_v22 = vld [vmem:[#allocation6 + $0x18] sm:$0xff]  ;;  %s1678_s16 = smov 100   ;;  %vm665_vm2 = vcmask 31744  }
  0x3a   : > { %s1430_s18 = sshll.u32 %s2127_s13, 4  ;;  %1464 = vmatpush3.msra.mxu1 %v799_v1  ;;  %1454 = vmatprep.subr.mxu0 %v542_v2  ;;  %v796_v7 = vld [vmem:[#allocation4] sm:$0xff]  ;;  %v1025_v23 = vld [vmem:[#allocation6 + $0x10] sm:$0xff]  ;;  %v1024_v24 = vld [vmem:[#allocation6 + $0x8] sm:$0xff]  ;;  %s1679_s19 = smov 116  }
  0x3b   : > { %s490_s26 = scalar_lea.vmem %s2107_s0, %s1430_s18  ;;  %1465 = vmatprep.subr.mxu1 %v798_v3  ;;  %1455 = vmatpush3.msra.mxu0 %v542_v2  ;;  %v1023_v25 = vld [vmem:[#allocation6] sm:$0xff]  ;;  %s1680_s24 = smov 8   ;;  %v1897_v53 = vld [vmem:[%s2113_s6 + $0x8] sm:$0xff] }
  0x3c   : > { %1466 = vmatpush3.msra.mxu1 %v798_v3  ;;  %1456 = vmatprep.subr.mxu0 %v541_v4  ;;  %v534_v8 = vld [vmem:[%s490_s26] sm:$0xff]  ;;  %v535_v9 = vld [vmem:[%s490_s26 + $0x8] sm:$0xff]  ;;  %s1681_s25 = smov 16   ;;  %s1682_s18 = smov 24  }
  0x3d   : > { %1467 = vmatprep.subr.mxu1 %v797_v5  ;;  %1457 = vmatpush3.msra.mxu0 %v541_v4  ;;  %v1404_v39 = vld [vmem:[%s2111_s4] ss:$0 sm:$0xff]  ;;  %s1906_s26 = sshll.u32 %s2127_s13, 6  ;;  %v1924_v56 = vld [vmem:[%s2114_s7 + $0x8] sm:$0xff]  ;;  %s1685_s20 = smov 112  }
  0x3e   : > { %1468 = vmatpush3.msra.mxu1 %v797_v5  ;;  %1458 = vmatprep.subr.mxu0 %v540_v6  ;;  %v1413_v47 = vld [vmem:[%s2112_s5] ss:$0 sm:$0xff]  ;;  %s1686_s23 = smov 104   ;;  %s2037_s27 = scalar_lea.vmem %s2116_s9, %s1906_s26 }
  0x3f   : > { %1469 = vmatprep.subr.mxu1 %v796_v7  ;;  %1459 = vmatpush3.msra.mxu0 %v540_v6  ;;  %v1883_v52 = vld [vmem:[%s2113_s6] sm:$0xff] }
  0x40   : > { %1460 = vmatprep.mubr.msk.f32.mxu0 %vm544_vm0, %v534_v8  ;;  %1470 = vmatpush3.msra.mxu1 %v796_v7 }
  0x41   : > { %1471 = vmatprep.mubr.msk.f32.mxu1 %vm544_vm0, %v534_v8  ;;  %1461 = vmatmul.mubr.msk.f32.vlgmr.msra.gmra.mxu0 %vm544_vm0, %v535_v9 }
  0x42   : > { %1472 = vmatmul.mubr.msk.f32.vlgmr.msra.gmra.mxu1 %vm544_vm0, %v535_v9  ;;  %1482 = vmatprep.mubr.msk.f32.mxu0 %vm544_vm0, %v534_v8 }
  0x43   : > { %1474 = vmatprep.subr.mxu0 %v1026_v22 }
  0x44   : > { %1475 = vmatpush3.msra.mxu0 %v1026_v22 }
  0x45   : > { %1476 = vmatprep.subr.mxu0 %v1025_v23 }
  0x46   : > { %1477 = vmatpush3.msra.mxu0 %v1025_v23 }
  0x47   : > { %1478 = vmatprep.subr.mxu0 %v1024_v24 }
  0x48   : > { %1479 = vmatpush3.msra.mxu0 %v1024_v24 }
  0x49   : > { %1480 = vmatprep.subr.mxu0 %v1023_v25 }
  0x4a   : > { %1481 = vmatpush3.msra.mxu0 %v1023_v25 }
  0x4b   : > { %1483 = vmatmul.mubr.msk.f32.vlgmr.msra.gmra.mxu0 %vm544_vm0, %v535_v9 }
 0x101   : > { %v1462_v10 = vpop.f32.mrf.mxu0 }
 0x102   : > { %v1843_v11 = vpop.f32.mrf.mxu1  ;;  %v627_v17 = vmul.f32 %v1462_v10, %v1462_v10 }
 0x103   : > { %v617_v12 = vpop.f32.mrf.mxu0  ;;  %v876_v14 = vmul.f32 %v1843_v11, %v1843_v11 }
 0x104   : > { %v866_v13 = vpop.f32.mrf.mxu1  ;;  %v626_v16 = vmul.f32 %v617_v12, %v617_v12  ;;  %v631_v21 = vsel %vm544_vm0, %v627_v17, 0.0 }
 0x105   : > { %v875_v15 = vmul.f32 %v866_v13, %v866_v13  ;;  %v880_v20 = vsel %vm544_vm0, %v876_v14, 0.0 }
 0x106   : > { %v628_v19 = vsel %vm544_vm0, %v626_v16, 0.0 }
 0x107   : > { %v877_v18 = vsel %vm544_vm0, %v875_v15, 0.0  ;;  %629 = vadd.xlane.f32.xlu0 %v628_v19  ;;  %v1957_v15 = vld [vmem:[%s2114_s7] sm:$0xff] }
 0x108   : > { %878 = vadd.xlane.f32.xlu1 %v877_v18 }
 0x10b   : > { %632 = vadd.xlane.f32.xlu0 %v631_v21  ;;  %v1914_v54 = vpop.f32.mrf.mxu0 }
 0x10c   : > { %881 = vadd.xlane.f32.xlu1 %v880_v20 }
 0x10d   : > { %v1928_v59 = vpop.f32.mrf.mxu0 }
 0x190   : > { %v630_v26 = vpop.xlane.xlu0 %629 }
 0x191   : > { %v634_v27 = vmul.f32 0.03125, %v630_v26  ;;  %v879_v28 = vpop.xlane.xlu1 %878 }
 0x192   : > { %v883_v32 = vmul.f32 0.03125, %v879_v28 }
 0x193   : > { %v636_v29 = vadd.f32 32.0, %v634_v27 }
 0x194   : > { %v633_v30 = vpop.xlane.xlu0 %632  ;;  %v885_v34 = vadd.f32 32.0, %v883_v32 }
 0x195   : > { %v635_v31 = vmul.f32 0.03125, %v633_v30  ;;  %1553 = vrsqrt.f32 %v636_v29  ;;  %v882_v35 = vpop.xlane.xlu1 %881 }
 0x196   : > { %v884_v36 = vmul.f32 0.03125, %v882_v35 }
 0x197   : > { %v637_v33 = vadd.f32 32.0, %v635_v31 }
 0x198   : > { %v886_v37 = vadd.f32 32.0, %v884_v36 }
 0x199   : > { %1555 = vrsqrt.f32 %v637_v33 }
 0x19a   : > { %1557 = vrsqrt.f32 %v885_v34 }
 0x19b   : > { %1559 = vrsqrt.f32 %v886_v37 }
 0x1a2   : > { %v1554_v38 = vpop.eup %1553 }
 0x1a3   : > { %v640_v40 = vmul.f32 %v1554_v38, %v617_v12 }
 0x1a5   : > { %v1855_v41 = vmul.f32 %v1404_v39, %v640_v40 }
 0x1a6   : > { %v1556_v42 = vpop.eup %1555 }
 0x1a7   : > { %v641_v43 = vmul.f32 %v1556_v42, %v1462_v10  ;;  %653 = vrot.lane.b32.xlu0 %v1855_v41, %s1676_s29  ;;  %v1558_v45 = vpop.eup %1557 }
 0x1a8   : > { %v889_v46 = vmul.f32 %v1558_v45, %v866_v13  ;;  %v1560_v49 = vpop.eup %1559 }
 0x1a9   : > { %v1858_v44 = vmul.f32 %v1404_v39, %v641_v43  ;;  %v890_v50 = vmul.f32 %v1560_v49, %v1843_v11 }
 0x1aa   : > { %v1867_v48 = vmul.f32 %v1413_v47, %v889_v46 }
 0x1ab   : > { %718 = vrot.lane.b32.xlu0 %v1855_v41, %s1677_s30  ;;  %655 = vrot.lane.b32.xlu1 %v1858_v44, %s1676_s29  ;;  %v1874_v51 = vmul.f32 %v1413_v47, %v890_v50 }
 0x1af   : > { %757 = vrot.lane.b32.xlu0 %v1855_v41, %s1678_s16  ;;  %679 = vrot.lane.b32.xlu1 %v1858_v44, %s1679_s19 }
 0x1b3   : > { %902 = vrot.lane.b32.xlu0 %v1867_v48, %s1676_s29  ;;  %720 = vrot.lane.b32.xlu1 %v1858_v44, %s1677_s30 }
 0x1b7   : > { %924 = vrot.lane.b32.xlu0 %v1867_v48, %s1679_s19  ;;  %759 = vrot.lane.b32.xlu1 %v1858_v44, %s1678_s16 }
 0x1bb   : > { %957 = vrot.lane.b32.xlu0 %v1867_v48, %s1677_s30  ;;  %904 = vrot.lane.b32.xlu1 %v1874_v51, %s1676_s29  ;;  %s1912_s29 = scalar_lea.vmem %s2117_s10, %s1906_s26 }
 0x1bc   : > { %1103 = vst.msk [vmem:[%s1912_s29 + $0x8] sm:$0xff] %vm674_vm1, %v1914_v54  ;;  %1102 = vst.msk [vmem:[%s1912_s29] sm:$0xff] %vm674_vm1, %v1928_v59 }
 0x1bf   : > { %990 = vrot.lane.b32.xlu0 %v1867_v48, %s1678_s16  ;;  %926 = vrot.lane.b32.xlu1 %v1874_v51, %s1679_s19 }
 0x1c3   : > { %687 = vrot.lane.b32.xlu0 %v1883_v52, %s1680_s24  ;;  %959 = vrot.lane.b32.xlu1 %v1874_v51, %s1677_s30 }
 0x1c7   : > { %726 = vrot.lane.b32.xlu0 %v1883_v52, %s1681_s25  ;;  %677 = vrot.lane.b32.xlu1 %v1855_v41, %s1679_s19  ;;  %s1684_s19 = smov 120  }
 0x1cb   : > { %765 = vrot.lane.b32.xlu0 %v1883_v52, %s1682_s18  ;;  %992 = vrot.lane.b32.xlu1 %v1874_v51, %s1678_s16  ;;  %s1683_s16 = smov 4  }
 0x1cf   : > { %689 = vrot.lane.b32.xlu1 %v1897_v53, %s1680_s24 }
 0x1d3   : > { %728 = vrot.lane.b32.xlu1 %v1897_v53, %s1681_s25 }
 0x1d7   : > { %767 = vrot.lane.b32.xlu1 %v1897_v53, %s1682_s18 }
 0x219   : > { %v1934_v61 = vpop.permute.xlu0 %653 }
 0x21d   : > { %v1919_v55 = vpop.permute.xlu1 %655  ;;  %v719_v3 = vpop.permute.xlu0 %718 }
 0x221   : > { %v680_v57 = vpop.permute.xlu1 %679  ;;  %v758_v6 = vpop.permute.xlu0 %757 }
 0x222   : > { %v684_v58 = vsel %vm665_vm2, %v680_v57, %v1919_v55  ;;  %v763_v24 = vsel %vm665_vm2, %v758_v6, %v719_v3 }
 0x223   : > { %v696_v60 = vmul.f32 %v684_v58, %v1924_v56  ;;  %v773_v25 = vmul.f32 %v763_v24, %v1957_v15 }
 0x225   : > { %701 = vrot.lane.b32.xlu1 %v696_v60, %s1680_s24  ;;  %v721_v62 = vpop.permute.xlu1 %720  ;;  %v1950_v12 = vpop.permute.xlu0 %902 }
 0x226   : > { %v725_v63 = vsel %vm665_vm2, %v721_v62, %v680_v57 }
 0x227   : > { %v735_v0 = vmul.f32 %v725_v63, %v1924_v56 }
 0x229   : > { %740 = vrot.lane.b32.xlu1 %v735_v0, %s1681_s25  ;;  %v760_v1 = vpop.permute.xlu1 %759  ;;  %v925_v19 = vpop.permute.xlu0 %924 }
 0x22a   : > { %v764_v2 = vsel %vm665_vm2, %v760_v1, %v721_v62  ;;  %v930_v27 = vsel %vm665_vm2, %v925_v19, %v1950_v12 }
 0x22b   : > { %v774_v4 = vmul.f32 %v764_v2, %v1924_v56  ;;  %v934_v28 = vmul.f32 %v930_v27, %v1957_v15 }
 0x22d   : > { %779 = vrot.lane.b32.xlu1 %v774_v4, %s1682_s18  ;;  %v1943_v5 = vpop.permute.xlu1 %904  ;;  %v958_v26 = vpop.permute.xlu0 %957 }
 0x22e   : > { %v963_v29 = vsel %vm665_vm2, %v958_v26, %v925_v19  ;;  %v669_v19 = vmul.f32 %v1858_v44, %v1897_v53 }
 0x22f   : > { %v967_v31 = vmul.f32 %v963_v29, %v1957_v15 }
 0x231   : > { %v927_v7 = vpop.permute.xlu1 %926  ;;  %v991_v30 = vpop.permute.xlu0 %990 }
 0x232   : > { %v931_v8 = vsel %vm665_vm2, %v927_v7, %v1943_v5  ;;  %v996_v32 = vsel %vm665_vm2, %v991_v30, %v958_v26 }
 0x233   : > { %v935_v9 = vmul.f32 %v931_v8, %v1924_v56  ;;  %v1000_v33 = vmul.f32 %v996_v32, %v1957_v15 }
 0x235   : > { %940 = vrot.lane.b32.xlu1 %v935_v9, %s1680_s24  ;;  %v960_v10 = vpop.permute.xlu1 %959  ;;  %v688_v46 = vpop.permute.xlu0 %687 }
 0x236   : > { %v964_v11 = vsel %vm665_vm2, %v960_v10, %v927_v7  ;;  %v693_v2 = vmul.f32 %v688_v46, %v1855_v41 }
 0x237   : > { %v968_v13 = vmul.f32 %v964_v11, %v1924_v56 }
 0x239   : > { %973 = vrot.lane.b32.xlu1 %v968_v13, %s1681_s25  ;;  %v678_v14 = vpop.permute.xlu1 %677  ;;  %v727_v50 = vpop.permute.xlu0 %726 }
 0x23a   : > { %v683_v16 = vsel %vm665_vm2, %v678_v14, %v1934_v61  ;;  %v724_v18 = vsel %vm665_vm2, %v719_v3, %v678_v14  ;;  %v732_v6 = vmul.f32 %v727_v50, %v1855_v41 }
 0x23b   : > { %v695_v17 = vmul.f32 %v683_v16, %v1957_v15  ;;  %v734_v22 = vmul.f32 %v724_v18, %v1957_v15 }
 0x23d   : > { %v993_v20 = vpop.permute.xlu1 %992  ;;  %699 = vrot.lane.b32.xlu0 %v695_v17, %s1680_s24  ;;  %v766_v63 = vpop.permute.xlu0 %765 }
 0x23e   : > { %v997_v21 = vsel %vm665_vm2, %v993_v20, %v960_v10  ;;  %v771_v13 = vmul.f32 %v766_v63, %v1855_v41 }
 0x23f   : > { %v1001_v23 = vmul.f32 %v997_v21, %v1924_v56  ;;  %v932_v21 = vmul.f32 %v1867_v48, %v688_v46 }
 0x241   : > { %1006 = vrot.lane.b32.xlu1 %v1001_v23, %s1682_s18  ;;  %738 = vrot.lane.b32.xlu0 %v734_v22, %s1681_s25  ;;  %v690_v34 = vpop.permute.xlu1 %689 }
 0x242   : > { %v694_v37 = vmul.f32 %v690_v34, %v1858_v44  ;;  %v933_v57 = vmul.f32 %v1874_v51, %v690_v34 }
 0x245   : > { %661 = vrot.lane.b32.xlu1 %v1858_v44, %s1683_s16  ;;  %777 = vrot.lane.b32.xlu0 %v773_v25, %s1682_s18  ;;  %v729_v35 = vpop.permute.xlu1 %728  ;;  %v917_v25 = vmul.f32 %v1874_v51, %v1897_v53 }
 0x246   : > { %v733_v40 = vmul.f32 %v729_v35, %v1858_v44  ;;  %v966_v62 = vmul.f32 %v1874_v51, %v729_v35 }
 0x249   : > { %910 = vrot.lane.b32.xlu1 %v1874_v51, %s1683_s16  ;;  %938 = vrot.lane.b32.xlu0 %v934_v28, %s1680_s24  ;;  %v768_v36 = vpop.permute.xlu1 %767 }
 0x24a   : > { %v772_v45 = vmul.f32 %v768_v36, %v1858_v44  ;;  %v999_v7 = vmul.f32 %v1874_v51, %v768_v36  ;;  %v998_v51 = vmul.f32 %v1867_v48, %v766_v63 }
 0x24d   : > { %971 = vrot.lane.b32.xlu0 %v967_v31, %s1681_s25  ;;  %1108 = vrot.lane.b32.xlu1 %v1914_v54, %s1684_s19 }
 0x251   : > { %1004 = vrot.lane.b32.xlu0 %v1000_v33, %s1682_s18  ;;  %1117 = vrot.lane.b32.xlu1 %v1914_v54, %s1685_s20  ;;  %s2020_s18 = scalar_lea.vmem %s2115_s8, %s1906_s26  ;;  %v668_v33 = vmul.f32 %v1855_v41, %v1883_v52 }
 0x255   : > { %659 = vrot.lane.b32.xlu0 %v1855_v41, %s1683_s16 }
 0x259   : > { %908 = vrot.lane.b32.xlu0 %v1867_v48, %s1683_s16 }
 0x25d   : > { %1106 = vrot.lane.b32.xlu0 %v1928_v59, %s1684_s19 }
 0x261   : > { %1115 = vrot.lane.b32.xlu0 %v1928_v59, %s1685_s20 }
 0x297   : > { %v702_v38 = vpop.permute.xlu1 %701 }
 0x298   : > { %v706_v39 = vadd.f32 %v702_v38, %v694_v37 }
 0x29a   : > { %711 = vrot.lane.b32.xlu1 %v706_v39, %s1684_s19 }
 0x29b   : > { %v741_v42 = vpop.permute.xlu1 %740 }
 0x29c   : > { %v745_v43 = vadd.f32 %v741_v42, %v733_v40 }
 0x29e   : > { %750 = vrot.lane.b32.xlu1 %v745_v43, %s1685_s20 }
 0x29f   : > { %v780_v47 = vpop.permute.xlu1 %779 }
 0x2a0   : > { %v784_v49 = vadd.f32 %v780_v47, %v772_v45 }
 0x2a2   : > { %789 = vrot.lane.b32.xlu1 %v784_v49, %s1686_s23 }
 0x2a7   : > { %v941_v58 = vpop.permute.xlu1 %940 }
 0x2a8   : > { %v945_v60 = vadd.f32 %v941_v58, %v933_v57 }
 0x2aa   : > { %950 = vrot.lane.b32.xlu1 %v945_v60, %s1684_s19 }
 0x2ab   : > { %v974_v0 = vpop.permute.xlu1 %973 }
 0x2ac   : > { %v978_v1 = vadd.f32 %v974_v0, %v966_v62 }
 0x2ae   : > { %983 = vrot.lane.b32.xlu1 %v978_v1, %s1685_s20 }
 0x2af   : > { %v700_v3 = vpop.permute.xlu0 %699 }
 0x2b0   : > { %v705_v4 = vadd.f32 %v700_v3, %v693_v2 }
 0x2b2   : > { %709 = vrot.lane.b32.xlu0 %v705_v4, %s1684_s19 }
 0x2b3   : > { %v1007_v8 = vpop.permute.xlu1 %1006  ;;  %v739_v9 = vpop.permute.xlu0 %738 }
 0x2b4   : > { %v1011_v10 = vadd.f32 %v1007_v8, %v999_v7  ;;  %v744_v11 = vadd.f32 %v739_v9, %v732_v6 }
 0x2b6   : > { %1016 = vrot.lane.b32.xlu1 %v1011_v10, %s1686_s23  ;;  %748 = vrot.lane.b32.xlu0 %v744_v11, %s1685_s20 }
 0x2b7   : > { %v662_v14 = vpop.permute.xlu1 %661  ;;  %v778_v16 = vpop.permute.xlu0 %777 }
 0x2b8   : > { %v667_v17 = vsel %vm665_vm2, %v1919_v55, %v662_v14  ;;  %v783_v18 = vadd.f32 %v778_v16, %v771_v13 }
 0x2b9   : > { %v671_v20 = vmul.f32 %v667_v17, %v1924_v56 }
 0x2ba   : > { %1126 = vrot.lane.b32.xlu1 %v1914_v54, %s1686_s23  ;;  %787 = vrot.lane.b32.xlu0 %v783_v18, %s1686_s23  ;;  %v965_v54 = vmul.f32 %v1867_v48, %v727_v50 }
 0x2bb   : > { %v673_v55 = vadd.f32 %v671_v20, %v669_v19  ;;  %v911_v22 = vpop.permute.xlu1 %910  ;;  %v939_v23 = vpop.permute.xlu0 %938 }
 0x2bc   : > { %v915_v44 = vsel %vm665_vm2, %v1943_v5, %v911_v22  ;;  %v944_v24 = vadd.f32 %v939_v23, %v932_v21 }
 0x2bd   : > { %676 = vst.msk [vmem:[%s2020_s18 + $0x8] sm:$0xff] %vm674_vm1, %v673_v55  ;;  %v919_v26 = vmul.f32 %v915_v44, %v1924_v56 }
 0x2be   : > { %948 = vrot.lane.b32.xlu0 %v944_v24, %s1684_s19 }
 0x2bf   : > { %v921_v5 = vadd.f32 %v919_v26, %v917_v25  ;;  %v972_v27 = vpop.permute.xlu0 %971  ;;  %v1109_v28 = vpop.permute.xlu1 %1108 }
 0x2c0   : > { %v977_v29 = vadd.f32 %v972_v27, %v965_v54  ;;  %1423 = vst.msk [vmem:[%s1912_s29 + $0x18] sm:$0xff] %vm674_vm1, %v1109_v28 }
 0x2c1   : > { %923 = vst.msk [vmem:[%s2037_s27 + $0x8] sm:$0xff] %vm674_vm1, %v921_v5 }
 0x2c2   : > { %981 = vrot.lane.b32.xlu0 %v977_v29, %s1685_s20 }
 0x2c3   : > { %v1005_v53 = vpop.permute.xlu0 %1004  ;;  %v1118_v56 = vpop.permute.xlu1 %1117 }
 0x2c4   : > { %v1010_v30 = vadd.f32 %v1005_v53, %v998_v51  ;;  %1425 = vst.msk [vmem:[%s1912_s29 + $0x28] sm:$0xff] %vm674_vm1, %v1118_v56 }
 0x2c6   : > { %1014 = vrot.lane.b32.xlu0 %v1010_v30, %s1686_s23 }
 0x2c7   : > { %v660_v31 = vpop.permute.xlu0 %659 }
 0x2c8   : > { %v666_v32 = vsel %vm665_vm2, %v1934_v61, %v660_v31  ;;  %v916_v61 = vmul.f32 %v1867_v48, %v1883_v52 }
 0x2c9   : > { %v670_v34 = vmul.f32 %v666_v32, %v1957_v15 }
 0x2ca   : > { %1124 = vrot.lane.b32.xlu0 %v1928_v59, %s1686_s23 }
 0x2cb   : > { %v672_v35 = vadd.f32 %v670_v34, %v668_v33  ;;  %v909_v36 = vpop.permute.xlu0 %908 }
 0x2cc   : > { %v914_v37 = vsel %vm665_vm2, %v1950_v12, %v909_v36 }
 0x2cd   : > { %675 = vst.msk [vmem:[%s2020_s18] sm:$0xff] %vm674_vm1, %v672_v35  ;;  %v918_v41 = vmul.f32 %v914_v37, %v1957_v15 }
 0x2cf   : > { %v920_v38 = vadd.f32 %v918_v41, %v916_v61  ;;  %v1107_v39 = vpop.permute.xlu0 %1106 }
 0x2d0   : > { %1422 = vst.msk [vmem:[%s1912_s29 + $0x10] sm:$0xff] %vm674_vm1, %v1107_v39 }
 0x2d1   : > { %922 = vst.msk [vmem:[%s2037_s27] sm:$0xff] %vm674_vm1, %v920_v38 }
 0x2d3   : > { %v1116_v59 = vpop.permute.xlu0 %1115 }
 0x2d4   : > { %1424 = vst.msk [vmem:[%s1912_s29 + $0x20] sm:$0xff] %vm674_vm1, %v1116_v59 }
 0x30c   : > { %v712_v12 = vpop.permute.xlu1 %711 }
 0x30d   : > { %1406 = vst.msk [vmem:[%s2020_s18 + $0x18] sm:$0xff] %vm674_vm1, %v712_v12 }
 0x310   : > { %v751_v40 = vpop.permute.xlu1 %750 }
 0x311   : > { %1408 = vst.msk [vmem:[%s2020_s18 + $0x28] sm:$0xff] %vm674_vm1, %v751_v40 }
 0x314   : > { %v790_v48 = vpop.permute.xlu1 %789 }
 0x315   : > { %1410 = vst.msk [vmem:[%s2020_s18 + $0x38] sm:$0xff] %vm674_vm1, %v790_v48 }
 0x31c   : > { %v951_v52 = vpop.permute.xlu1 %950 }
 0x31d   : > { %1415 = vst.msk [vmem:[%s2037_s27 + $0x18] sm:$0xff] %vm674_vm1, %v951_v52 }
 0x320   : > { %v984_v15 = vpop.permute.xlu1 %983 }
 0x321   : > { %1417 = vst.msk [vmem:[%s2037_s27 + $0x28] sm:$0xff] %vm674_vm1, %v984_v15 }
 0x324   : > { %v710_v42 = vpop.permute.xlu0 %709 }
 0x325   : > { %1405 = vst.msk [vmem:[%s2020_s18 + $0x10] sm:$0xff] %vm674_vm1, %v710_v42 }
 0x328   : > { %v1017_v43 = vpop.permute.xlu1 %1016  ;;  %v749_v45 = vpop.permute.xlu0 %748 }
 0x329   : > { %1419 = vst.msk [vmem:[%s2037_s27 + $0x38] sm:$0xff] %vm674_vm1, %v1017_v43  ;;  %1407 = vst.msk [vmem:[%s2020_s18 + $0x20] sm:$0xff] %vm674_vm1, %v749_v45 }
 0x32c   : > { %v1127_v46 = vpop.permute.xlu1 %1126  ;;  %v788_v47 = vpop.permute.xlu0 %787 }
 0x32d   : > { %1427 = vst.msk [vmem:[%s1912_s29 + $0x38] sm:$0xff] %vm674_vm1, %v1127_v46  ;;  %1409 = vst.msk [vmem:[%s2020_s18 + $0x30] sm:$0xff] %vm674_vm1, %v788_v47 }
 0x330   : > { %v949_v49 = vpop.permute.xlu0 %948 }
 0x331   : > { %1414 = vst.msk [vmem:[%s2037_s27 + $0x10] sm:$0xff] %vm674_vm1, %v949_v49 }
 0x334   : > { %v982_v50 = vpop.permute.xlu0 %981 }
 0x335   : > { %1416 = vst.msk [vmem:[%s2037_s27 + $0x20] sm:$0xff] %vm674_vm1, %v982_v50 }
 0x338   : > { %v1015_v57 = vpop.permute.xlu0 %1014 }
 0x339   : > { %1418 = vst.msk [vmem:[%s2037_s27 + $0x30] sm:$0xff] %vm674_vm1, %v1015_v57 }
 0x33c   : > { %v1125_v58 = vpop.permute.xlu0 %1124 }
 0x33d   : > { %1426 = vst.msk [vmem:[%s1912_s29 + $0x30] sm:$0xff] %vm674_vm1, %v1125_v58 }
 0x33e PF: > { %s23_s15 = sadd.s32 1, %s1669_s15   ;;  %s2122_s13 = smov %s1665_s14 }
 0x33f   : > { %p20_p2 = scmp.ge.s32.totalorder %s23_s15, 4   ;;  %s2123_s14 = smov %s2125_s22 }
 0x341   :  { %22 = sbr.rel (!%p20_p2) target bundleno = 3 (0x3), region = 134 }
 0x346   :  { %1213 = vsyncpa [#allocation3], 1 }
 0x347   :  { %1215 = vsyncpa [#allocation3 + $0x1], 1 }
 0x348   :  { %1216 = vsyncpa [#allocation5], 1 }

</bundles_post_ra>
